<compile_context>
chip_gen: v5e
topology: v5e:2x2
jax: 0.10.0
libtpu: 0.0.40
codegen_flags: <defaults>
</compile_context>

<pallas_src>
import functools

import jax
import jax.numpy as jnp
import numpy as np
from jax.experimental import pallas as pl
from jax.experimental.pallas import tpu as pltpu


def _round_up(a, m):
    return (a + m - 1) // m * m


def _fused_cnn_kernel(x_ref, mask_ref, *refs, dims, K, W):
    """Fused n-layer 'same' Conv1d stack on a lane-folded (C, W) layout.

    x_ref    : (1, 1, W)  one block of batch segments, each segment framed by
                          K//2 zero columns on both sides; W is a multiple of 128.
    mask_ref : (1, W)     f32 0/1 mask, 1 on data columns, 0 on pad columns.
    refs     : w_0, b_0, ..., w_{n-1}, b_{n-1}, o_ref
               w_l : (K, c_out, c_in)  for the MXU path / c_in == 1 path
                     (K, c_in, 1)      for the specialized c_out == 1 path
               b_l : (c_out, 1)
               o_ref: (1, 1, W)
    """
    n = len(dims)
    o_ref = refs[2 * n]
    w_refs = refs[0:2 * n:2]
    b_refs = refs[1:2 * n:2]
    p = K // 2

    mask = mask_ref[...]                       # (1, W) — hoisted, reused per layer
    h = x_ref[0].astype(jnp.float32)           # (1, W)

    for l, (c_in, c_out) in enumerate(dims):
        w = w_refs[l]

        def tap(k):
            # tap(k)[:, i] == h[:, i + (k - p)]  (wrap lanes hit zero pads only)
            s = (p - k) % W
            return h if s == 0 else pltpu.roll(h, shift=s, axis=1)

        if c_in == 1:
            # VPU path: rank-1 taps as broadcast FMAs.  w[k] : (c_out, 1)
            acc = w[0] * tap(0)
            for k in range(1, K):
                acc = acc + w[k] * tap(k)
        elif c_out == 1:
            # Specialized last layer: broadcast multiplies + one sublane (XLU)
            # reduction instead of a 1-row MXU matmul.  w[k] : (c_in, 1)
            full = w[0] * tap(0)
            for k in range(1, K):
                full = full + w[k] * tap(k)
            acc = jnp.sum(full, axis=0, keepdims=True)          # (1, W)
        else:
            # MXU path: K accumulating (c_out, c_in) @ (c_in, W) matmuls.
            acc = jnp.dot(w[0], tap(0), preferred_element_type=jnp.float32)
            for k in range(1, K):
                acc = acc + jnp.dot(w[k], tap(k),
                                    preferred_element_type=jnp.float32)

        acc = acc + b_refs[l][...]                               # (c_out, W)
        if l < n - 1:
            # ReLU + restore exact zeros on pad columns so the next layer sees
            # proper 'same' zero padding (pad columns of the output are never
            # read by the wrapper, so the last layer skips this).
            acc = jnp.maximum(acc, 0.0) * mask
        h = acc

    o_ref[0] = h.astype(o_ref.dtype)


def simple_cnn_forward(x, params, *, segs_per_block=None):
    """x: (B, 1, L) float32, NCL layout (PyTorch Conv1d convention)."""
    B, c_in0, L = x.shape
    assert c_in0 == 1, "SimpleCNN input has a single channel"
    n = len(params)
    K = int(params[0][0].shape[2])
    if K % 2 == 0:
        # TODO(synk): even kernel_size with padding=K//2 changes the length per
        # layer in PyTorch (L -> L+1); not supported by the fused kernel.
        raise NotImplementedError("fused kernel requires odd kernel_size")
    p = K // 2
    dims = tuple((int(w.shape[1]), int(w.shape[0])) for w, _ in params)

    # ---- choose how many batch segments go into each grid block ------------
    seg_w = L + 2 * p
    if segs_per_block is None:
        segs_per_block = max(1, 512 // seg_w)          # ~512-lane blocks
        segs_per_block = min(segs_per_block, B)
        if B >= 2:                                     # >= 2 blocks for v7x megacore
            segs_per_block = min(segs_per_block, (B + 1) // 2)
    bpb = segs_per_block
    nb = -(-B // bpb)                                  # number of grid blocks
    Bp = nb * bpb
    Wb = _round_up(bpb * seg_w, 128)                   # fixed 128-aligned frame

    # ---- lane-fold & frame the input: [p | seg | p] per segment, per block --
    xb = x.reshape(B, L)
    if Bp > B:
        xb = jnp.pad(xb, ((0, Bp - B), (0, 0)))
    xb = xb.reshape(nb, bpb, L)
    xb = jnp.pad(xb, ((0, 0), (0, 0), (p, p))).reshape(nb, bpb * seg_w)
    xb = jnp.pad(xb, ((0, 0), (0, Wb - bpb * seg_w)))
    x_pad = xb.reshape(nb, 1, Wb)

    # ---- precomputed data-column mask (no iota / % L on the vector path) ---
    mask_np = np.zeros((1, Wb), np.float32)
    for j in range(bpb):
        mask_np[0, j * seg_w + p: j * seg_w + p + L] = 1.0
    mask = jnp.asarray(mask_np)

    # ---- weight layouts ------------------------------------------------------
    layer_inputs = []
    for (w, b) in params:
        c_out, c_in, kk = w.shape
        if c_in == 1:
            w2 = jnp.transpose(w, (2, 0, 1))           # (K, c_out, 1)  VPU FMA
        elif c_out == 1:
            w2 = jnp.transpose(w, (2, 1, 0))           # (K, c_in, 1)   VPU+reduce
        else:
            w2 = jnp.transpose(w, (2, 0, 1))           # (K, c_out, c_in) MXU
        layer_inputs += [w2, b.reshape(c_out, 1)]

    flat_inputs = [x_pad, mask] + layer_inputs

    in_specs = [pl.BlockSpec((1, 1, Wb), lambda i: (i, 0, 0)),
                pl.BlockSpec((1, Wb), lambda i: (0, 0))]
    for a in layer_inputs:
        zero_idx = (0,) * a.ndim
        in_specs.append(pl.BlockSpec(a.shape, lambda i, z=zero_idx: z))
    out_specs = pl.BlockSpec((1, 1, Wb), lambda i: (i, 0, 0))

    kernel = functools.partial(_fused_cnn_kernel, dims=dims, K=K, W=Wb)
    out3 = pl.pallas_call(
        kernel,
        out_shape=jax.ShapeDtypeStruct((nb, 1, Wb), x.dtype),
        grid=(nb,),
        in_specs=in_specs,
        out_specs=out_specs,
        compiler_params=pltpu.CompilerParams(
            dimension_semantics=("parallel",)),
    )(*flat_inputs)

    out = out3.reshape(nb, Wb)[:, :bpb * seg_w]
    out = out.reshape(Bp, seg_w)[:, p:p + L][:B]
    return out.reshape(B, 1, L)


def init_simple_cnn_params(key, n_layers=3, kernel_size=3, hidden_size=64):
    """Deterministic params matching PyTorch Conv1d default init shapes."""
    if n_layers == 1:
        dims = [(1, 1)]
    else:
        dims = [(1, hidden_size)]
        dims += [(hidden_size, hidden_size)] * (n_layers - 2)
        dims += [(hidden_size, 1)]
    params = []
    for (c_in, c_out) in dims:
        key, kw, kb = jax.random.split(key, 3)
        bound = 1.0 / np.sqrt(c_in * kernel_size)
        w = jax.random.uniform(kw, (c_out, c_in, kernel_size),
                               jnp.float32, -bound, bound)
        b = jax.random.uniform(kb, (c_out,), jnp.float32, -bound, bound)
        params.append((w, b))
    return params


def _ref_forward(x, params):
    """Pure-JAX reference for correctness checking."""
    n = len(params)
    for i, (w, b) in enumerate(params):
        C_out, C_in, K = w.shape
        p = K // 2
        L = x.shape[-1]
        L_out = L + 2 * p - K + 1
        xp = jnp.pad(x, ((0, 0), (0, 0), (p, p)))
        out = jnp.zeros((x.shape[0], C_out, L_out), jnp.float32)
        for k in range(K):
            out = out + jnp.einsum('oi,bil->bol', w[:, :, k],
                                   xp[:, :, k:k + L_out])
        out = out + b[None, :, None]
        if i < n - 1:
            out = jnp.maximum(out, 0.0)
        x = out
    return x


if __name__ == "__main__":
    key = jax.random.PRNGKey(0)
    k_params, k_x = jax.random.split(key)

    n_layers, kernel_size, hidden_size = 3, 3, 32   # small shapes
    B, L = 2, 128
    params = init_simple_cnn_params(k_params, n_layers, kernel_size, hidden_size)
    x = jax.random.normal(k_x, (B, 1, L), jnp.float32)   # NCL, in_channels=1

    fwd = jax.jit(simple_cnn_forward)
    out = jax.block_until_ready(fwd(x, params))

    ref = _ref_forward(x, params)
    assert out.shape == (B, 1, L), out.shape
    np.testing.assert_allclose(np.asarray(out), np.asarray(ref),
                               rtol=1e-4, atol=1e-4)
    print("KERNEL_OK")
</pallas_src>

<mosaic_0001>
module attributes {stable_mosaic.version = 11 : i64} {
  func.func @_fused_cnn_kernel(%arg0: i32, %arg1: memref<1x1x256xf32, #tpu.memory_space<vmem>>, %arg2: memref<1x256xf32, #tpu.memory_space<vmem>>, %arg3: memref<3x32x1xf32, #tpu.memory_space<vmem>>, %arg4: memref<32x1xf32, #tpu.memory_space<vmem>>, %arg5: memref<3x32x32xf32, #tpu.memory_space<vmem>>, %arg6: memref<32x1xf32, #tpu.memory_space<vmem>>, %arg7: memref<3x32x1xf32, #tpu.memory_space<vmem>>, %arg8: memref<1x1xf32, #tpu.memory_space<vmem>>, %arg9: memref<1x1x256xf32, #tpu.memory_space<vmem>>) attributes {dimension_semantics = [#tpu.dimension_semantics<parallel>], iteration_bounds = array<i64: 2>, scalar_prefetch = 0 : i64, scratch_operands = 0 : i64, tpu.core_type = #tpu.core_type<tc>, window_params = [{transform_indices = @transform_0, window_bounds = array<i64: 1, 1, 256>}, {pipeline_mode = #tpu.pipeline_mode<synchronous>, transform_indices = @transform_1, window_bounds = array<i64: 1, 256>}, {pipeline_mode = #tpu.pipeline_mode<synchronous>, transform_indices = @transform_2, window_bounds = array<i64: 3, 32, 1>}, {pipeline_mode = #tpu.pipeline_mode<synchronous>, transform_indices = @transform_3, window_bounds = array<i64: 32, 1>}, {pipeline_mode = #tpu.pipeline_mode<synchronous>, transform_indices = @transform_4, window_bounds = array<i64: 3, 32, 32>}, {pipeline_mode = #tpu.pipeline_mode<synchronous>, transform_indices = @transform_5, window_bounds = array<i64: 32, 1>}, {pipeline_mode = #tpu.pipeline_mode<synchronous>, transform_indices = @transform_6, window_bounds = array<i64: 3, 32, 1>}, {pipeline_mode = #tpu.pipeline_mode<synchronous>, transform_indices = @transform_7, window_bounds = array<i64: 1, 1>}, {transform_indices = @transform_8, window_bounds = array<i64: 1, 1, 256>}]} {
    %c0 = arith.constant 0 : index
    %c0_0 = arith.constant 0 : index
    %0 = vector.load %arg2[%c0, %c0_0] : memref<1x256xf32, #tpu.memory_space<vmem>>, vector<1x256xf32>
    %c0_1 = arith.constant 0 : index
    %c0_2 = arith.constant 0 : index
    %c0_3 = arith.constant 0 : index
    %1 = vector.load %arg1[%c0_1, %c0_2, %c0_3] : memref<1x1x256xf32, #tpu.memory_space<vmem>>, vector<1x1x256xf32>
    %2 = vector.shape_cast %1 : vector<1x1x256xf32> to vector<1x256xf32>
    %c0_4 = arith.constant 0 : index
    %c0_5 = arith.constant 0 : index
    %c0_6 = arith.constant 0 : index
    %3 = vector.load %arg3[%c0_4, %c0_5, %c0_6] : memref<3x32x1xf32, #tpu.memory_space<vmem>>, vector<1x32x1xf32>
    %4 = vector.shape_cast %3 : vector<1x32x1xf32> to vector<32x1xf32>
    %c1_i32 = arith.constant 1 : i32
    %5 = tpu.dynamic_rotate %2 by %c1_i32 dim 1 : vector<1x256xf32>, i32 -> vector<1x256xf32>
    %6 = vector.broadcast %4 : vector<32x1xf32> to vector<32x256xf32>
    %7 = vector.broadcast %5 : vector<1x256xf32> to vector<32x256xf32>
    %8 = arith.mulf %6, %7 : vector<32x256xf32>
    %c1 = arith.constant 1 : index
    %c0_7 = arith.constant 0 : index
    %c0_8 = arith.constant 0 : index
    %9 = vector.load %arg3[%c1, %c0_7, %c0_8] : memref<3x32x1xf32, #tpu.memory_space<vmem>>, vector<1x32x1xf32>
    %10 = vector.shape_cast %9 : vector<1x32x1xf32> to vector<32x1xf32>
    %11 = vector.broadcast %10 : vector<32x1xf32> to vector<32x256xf32>
    %12 = vector.broadcast %2 : vector<1x256xf32> to vector<32x256xf32>
    %13 = arith.mulf %11, %12 : vector<32x256xf32>
    %14 = arith.addf %8, %13 : vector<32x256xf32>
    %c2 = arith.constant 2 : index
    %c0_9 = arith.constant 0 : index
    %c0_10 = arith.constant 0 : index
    %15 = vector.load %arg3[%c2, %c0_9, %c0_10] : memref<3x32x1xf32, #tpu.memory_space<vmem>>, vector<1x32x1xf32>
    %16 = vector.shape_cast %15 : vector<1x32x1xf32> to vector<32x1xf32>
    %c255_i32 = arith.constant 255 : i32
    %17 = tpu.dynamic_rotate %2 by %c255_i32 dim 1 : vector<1x256xf32>, i32 -> vector<1x256xf32>
    %18 = vector.broadcast %16 : vector<32x1xf32> to vector<32x256xf32>
    %19 = vector.broadcast %17 : vector<1x256xf32> to vector<32x256xf32>
    %20 = arith.mulf %18, %19 : vector<32x256xf32>
    %21 = arith.addf %14, %20 : vector<32x256xf32>
    %c0_11 = arith.constant 0 : index
    %c0_12 = arith.constant 0 : index
    %22 = vector.load %arg4[%c0_11, %c0_12] : memref<32x1xf32, #tpu.memory_space<vmem>>, vector<32x1xf32>
    %23 = vector.broadcast %22 : vector<32x1xf32> to vector<32x256xf32>
    %24 = arith.addf %21, %23 : vector<32x256xf32>
    %cst = arith.constant 0.000000e+00 : f32
    %25 = vector.broadcast %cst : f32 to vector<32x256xf32>
    %26 = arith.maximumf %24, %25 : vector<32x256xf32>
    %27 = vector.broadcast %0 : vector<1x256xf32> to vector<32x256xf32>
    %28 = arith.mulf %26, %27 : vector<32x256xf32>
    %c0_13 = arith.constant 0 : index
    %c0_14 = arith.constant 0 : index
    %c0_15 = arith.constant 0 : index
    %29 = vector.load %arg5[%c0_13, %c0_14, %c0_15] : memref<3x32x32xf32, #tpu.memory_space<vmem>>, vector<1x32x32xf32>
    %30 = vector.shape_cast %29 : vector<1x32x32xf32> to vector<32x32xf32>
    %c1_i32_16 = arith.constant 1 : i32
    %31 = tpu.dynamic_rotate %28 by %c1_i32_16 dim 1 : vector<32x256xf32>, i32 -> vector<32x256xf32>
    %cst_17 = arith.constant dense<0.000000e+00> : vector<32x256xf32>
    %32 = tpu.matmul %30, %31, %cst_17 {dimension_numbers = #tpu.dot_dimension_numbers<[1], [0], [0], [1], [0, 0, 1, 1], [], []>} : vector<32x32xf32>, vector<32x256xf32>, vector<32x256xf32> -> vector<32x256xf32>
    %c1_18 = arith.constant 1 : index
    %c0_19 = arith.constant 0 : index
    %c0_20 = arith.constant 0 : index
    %33 = vector.load %arg5[%c1_18, %c0_19, %c0_20] : memref<3x32x32xf32, #tpu.memory_space<vmem>>, vector<1x32x32xf32>
    %34 = vector.shape_cast %33 : vector<1x32x32xf32> to vector<32x32xf32>
    %cst_21 = arith.constant dense<0.000000e+00> : vector<32x256xf32>
    %35 = tpu.matmul %34, %28, %cst_21 {dimension_numbers = #tpu.dot_dimension_numbers<[1], [0], [0], [1], [0, 0, 1, 1], [], []>} : vector<32x32xf32>, vector<32x256xf32>, vector<32x256xf32> -> vector<32x256xf32>
    %36 = arith.addf %32, %35 : vector<32x256xf32>
    %c2_22 = arith.constant 2 : index
    %c0_23 = arith.constant 0 : index
    %c0_24 = arith.constant 0 : index
    %37 = vector.load %arg5[%c2_22, %c0_23, %c0_24] : memref<3x32x32xf32, #tpu.memory_space<vmem>>, vector<1x32x32xf32>
    %38 = vector.shape_cast %37 : vector<1x32x32xf32> to vector<32x32xf32>
    %c255_i32_25 = arith.constant 255 : i32
    %39 = tpu.dynamic_rotate %28 by %c255_i32_25 dim 1 : vector<32x256xf32>, i32 -> vector<32x256xf32>
    %cst_26 = arith.constant dense<0.000000e+00> : vector<32x256xf32>
    %40 = tpu.matmul %38, %39, %cst_26 {dimension_numbers = #tpu.dot_dimension_numbers<[1], [0], [0], [1], [0, 0, 1, 1], [], []>} : vector<32x32xf32>, vector<32x256xf32>, vector<32x256xf32> -> vector<32x256xf32>
    %41 = arith.addf %36, %40 : vector<32x256xf32>
    %c0_27 = arith.constant 0 : index
    %c0_28 = arith.constant 0 : index
    %42 = vector.load %arg6[%c0_27, %c0_28] : memref<32x1xf32, #tpu.memory_space<vmem>>, vector<32x1xf32>
    %43 = vector.broadcast %42 : vector<32x1xf32> to vector<32x256xf32>
    %44 = arith.addf %41, %43 : vector<32x256xf32>
    %cst_29 = arith.constant 0.000000e+00 : f32
    %45 = vector.broadcast %cst_29 : f32 to vector<32x256xf32>
    %46 = arith.maximumf %44, %45 : vector<32x256xf32>
    %47 = vector.broadcast %0 : vector<1x256xf32> to vector<32x256xf32>
    %48 = arith.mulf %46, %47 : vector<32x256xf32>
    %c0_30 = arith.constant 0 : index
    %c0_31 = arith.constant 0 : index
    %c0_32 = arith.constant 0 : index
    %49 = vector.load %arg7[%c0_30, %c0_31, %c0_32] : memref<3x32x1xf32, #tpu.memory_space<vmem>>, vector<1x32x1xf32>
    %50 = vector.shape_cast %49 : vector<1x32x1xf32> to vector<32x1xf32>
    %c1_i32_33 = arith.constant 1 : i32
    %51 = tpu.dynamic_rotate %48 by %c1_i32_33 dim 1 : vector<32x256xf32>, i32 -> vector<32x256xf32>
    %52 = vector.broadcast %50 : vector<32x1xf32> to vector<32x256xf32>
    %53 = arith.mulf %52, %51 : vector<32x256xf32>
    %c1_34 = arith.constant 1 : index
    %c0_35 = arith.constant 0 : index
    %c0_36 = arith.constant 0 : index
    %54 = vector.load %arg7[%c1_34, %c0_35, %c0_36] : memref<3x32x1xf32, #tpu.memory_space<vmem>>, vector<1x32x1xf32>
    %55 = vector.shape_cast %54 : vector<1x32x1xf32> to vector<32x1xf32>
    %56 = vector.broadcast %55 : vector<32x1xf32> to vector<32x256xf32>
    %57 = arith.mulf %56, %48 : vector<32x256xf32>
    %58 = arith.addf %53, %57 : vector<32x256xf32>
    %c2_37 = arith.constant 2 : index
    %c0_38 = arith.constant 0 : index
    %c0_39 = arith.constant 0 : index
    %59 = vector.load %arg7[%c2_37, %c0_38, %c0_39] : memref<3x32x1xf32, #tpu.memory_space<vmem>>, vector<1x32x1xf32>
    %60 = vector.shape_cast %59 : vector<1x32x1xf32> to vector<32x1xf32>
    %c255_i32_40 = arith.constant 255 : i32
    %61 = tpu.dynamic_rotate %48 by %c255_i32_40 dim 1 : vector<32x256xf32>, i32 -> vector<32x256xf32>
    %62 = vector.broadcast %60 : vector<32x1xf32> to vector<32x256xf32>
    %63 = arith.mulf %62, %61 : vector<32x256xf32>
    %64 = arith.addf %58, %63 : vector<32x256xf32>
    %cst_41 = arith.constant dense<0.000000e+00> : vector<256xf32>
    %65 = vector.multi_reduction <add>, %64, %cst_41 [0] : vector<32x256xf32> to vector<256xf32>
    %66 = vector.shape_cast %65 : vector<256xf32> to vector<1x256xf32>
    %c0_42 = arith.constant 0 : index
    %c0_43 = arith.constant 0 : index
    %67 = vector.load %arg8[%c0_42, %c0_43] : memref<1x1xf32, #tpu.memory_space<vmem>>, vector<1x1xf32>
    %68 = vector.broadcast %67 : vector<1x1xf32> to vector<1x256xf32>
    %69 = arith.addf %66, %68 : vector<1x256xf32>
    %c0_44 = arith.constant 0 : index
    %c0_45 = arith.constant 0 : index
    %c0_46 = arith.constant 0 : index
    %70 = vector.load %arg9[%c0_44, %c0_45, %c0_46] : memref<1x1x256xf32, #tpu.memory_space<vmem>>, vector<1x1x256xf32>
    %71 = vector.shape_cast %70 : vector<1x1x256xf32> to vector<1x256xf32>
    %72 = vector.shape_cast %69 : vector<1x256xf32> to vector<1x1x256xf32>
    tpu.vector_store %arg9[%c0_44, %c0_45, %c0_46], %72 {strides = array<i32>} : memref<1x1x256xf32, #tpu.memory_space<vmem>>, vector<1x1x256xf32>,
    return
  }
  func.func @transform_0(%arg0: i32) -> (i32, i32, i32) {
    %c0_i32 = arith.constant 0 : i32
    %c0_i32_0 = arith.constant 0 : i32
    %c0_i32_1 = arith.constant 0 : i32
    return %arg0, %c0_i32, %c0_i32_0 : i32, i32, i32
  }
  func.func @transform_1(%arg0: i32) -> (i32, i32) {
    %c0_i32 = arith.constant 0 : i32
    %c0_i32_0 = arith.constant 0 : i32
    %c0_i32_1 = arith.constant 0 : i32
    return %c0_i32, %c0_i32_0 : i32, i32
  }
  func.func @transform_2(%arg0: i32) -> (i32, i32, i32) {
    %c0_i32 = arith.constant 0 : i32
    %c0_i32_0 = arith.constant 0 : i32
    %c0_i32_1 = arith.constant 0 : i32
    %c0_i32_2 = arith.constant 0 : i32
    return %c0_i32, %c0_i32_0, %c0_i32_1 : i32, i32, i32
  }
  func.func @transform_3(%arg0: i32) -> (i32, i32) {
    %c0_i32 = arith.constant 0 : i32
    %c0_i32_0 = arith.constant 0 : i32
    %c0_i32_1 = arith.constant 0 : i32
    return %c0_i32, %c0_i32_0 : i32, i32
  }
  func.func @transform_4(%arg0: i32) -> (i32, i32, i32) {
    %c0_i32 = arith.constant 0 : i32
    %c0_i32_0 = arith.constant 0 : i32
    %c0_i32_1 = arith.constant 0 : i32
    %c0_i32_2 = arith.constant 0 : i32
    return %c0_i32, %c0_i32_0, %c0_i32_1 : i32, i32, i32
  }
  func.func @transform_5(%arg0: i32) -> (i32, i32) {
    %c0_i32 = arith.constant 0 : i32
    %c0_i32_0 = arith.constant 0 : i32
    %c0_i32_1 = arith.constant 0 : i32
    return %c0_i32, %c0_i32_0 : i32, i32
  }
  func.func @transform_6(%arg0: i32) -> (i32, i32, i32) {
    %c0_i32 = arith.constant 0 : i32
    %c0_i32_0 = arith.constant 0 : i32
    %c0_i32_1 = arith.constant 0 : i32
    %c0_i32_2 = arith.constant 0 : i32
    return %c0_i32, %c0_i32_0, %c0_i32_1 : i32, i32, i32
  }
  func.func @transform_7(%arg0: i32) -> (i32, i32) {
    %c0_i32 = arith.constant 0 : i32
    %c0_i32_0 = arith.constant 0 : i32
    %c0_i32_1 = arith.constant 0 : i32
    return %c0_i32, %c0_i32_0 : i32, i32
  }
  func.func @transform_8(%arg0: i32) -> (i32, i32, i32) {
    %c0_i32 = arith.constant 0 : i32
    %c0_i32_0 = arith.constant 0 : i32
    %c0_i32_1 = arith.constant 0 : i32
    return %arg0, %c0_i32, %c0_i32_0 : i32, i32, i32
  }
}

</mosaic_0001>

<bundles_post_ra>
// kernel: simple_cnn_forward.1
= control target key start
LH: loop header
LB: loop body
LE: loop exit
PB: predicated region body
PF: predicated region fallthrough
CT: control target
= control target key end

     0   :  { %s1257_s29 = smov 0   ;;  %s1630_s0 = inlined_call_operand.vmem [shape: f32[2,1,256], index: 0, kind: input, shape index: {}]   ;;  %s1631_s1 = inlined_call_operand.vmem [shape: f32[1,256], index: 1, kind: input, shape index: {}]   ;;  %s1632_s2 = inlined_call_operand.vmem [shape: f32[3,32,1], index: 2, kind: input, shape index: {}]   ;;  %s1633_s3 = inlined_call_operand.vmem [shape: f32[32,1], index: 3, kind: input, shape index: {}]   ;;  %s1634_s4 = inlined_call_operand.vmem [shape: f32[3,32,32], index: 4, kind: input, shape index: {}]   ;;  %s1635_s5 = inlined_call_operand.vmem [shape: f32[32,1], index: 5, kind: input, shape index: {}]   ;;  %s1636_s6 = inlined_call_operand.vmem [shape: f32[3,32,1], index: 6, kind: input, shape index: {}]   ;;  %s1637_s7 = inlined_call_operand.<no memory space> [shape: f32[1,1], index: 7, kind: input, shape index: {}]   ;;  %s1638_s8 = inlined_call_operand.vmem [shape: f32[2,1,256], index: 8, kind: output, shape index: {}]  }
   0x1   :  { %v13_v0 = vstv %s1637_s7 }
   0x2   :  { %14 = vst [vmem:[#allocation2] sm:$0x1] %v13_v0 }
   0x3 LB: > { %s1079_s30 = sadd.s32 4294967295, %s1204_s29   ;;  %p1083_p0 = scmp.ge.s32.totalorder %s1204_s29, 1  ;;  %s1204_s29 = sphi %s1257_s29, %s20_s29  }
   0x4   : > { %p263_p1 = scmp.lt.s32.totalorder %s1204_s29, 3 }
   0x6   : > { %p264_p2 = pnand %p1083_p0, %p263_p1 }
   0x7   : > { %p295_p3 = scmp.lt.s32.totalorder (!%p264_p2), %s1079_s30, 1  ;;  %s1207_s16 = smov (!%p264_p2), 127  }
   0x8   : > { %267 = sbr.rel (%p264_p2) target bundleno = 633 (0x279), region = 52  ;;  %s1208_s17 = smov (!%p264_p2), 1  }
   0xd   : > { %v308_v1 = vld [vmem:[%s1632_s2 + $0x18] sm:$0xff]  ;;  %v1206_v2 = vmov 0   ;;  %s1640_s30 = smov (!%p295_p3, %s1079_s30), 1  ;;  %v1088_v8 = vld [vmem:[%s1632_s2 + $0x30] sm:$0xff]  ;;  %v1087_v10 = vld [vmem:[%s1632_s2 + $0x28] sm:$0xff]  ;;  %v318_v29 = vlaneseq  ;;  %vm530_vm2 = vcmask 261120  }
   0xe   : > { %1155 = vset.pattern.permute.xlu2 %v1206_v2  ;;  %1157 = vset.pattern.permute.xlu1 %v1206_v2  ;;  %s1084_s7 = sshll.u32 %s1640_s30, 1  ;;  %v1089_v5 = vld [vmem:[%s1632_s2 + $0x38] sm:$0xff]  ;;  %v307_v9 = vld [vmem:[%s1632_s2 + $0x10] sm:$0xff]  ;;  %v306_v11 = vld [vmem:[%s1632_s2 + $0x8] sm:$0xff]  ;;  %vm1018_vm3 = vcmask 1040384  }
   0xf   : > { %340 = vperm.xlu2 %1155, %v308_v1   ;;  %1156 = vset.pattern.permute.xlu0 %v1206_v2  ;;  %s298_s13 = scalar_lea.vmem %s1630_s0, %s1084_s7  ;;  %v1093_v7 = vld [vmem:[%s1632_s2 + $0x58] sm:$0xff]  ;;  %v1092_v12 = vld [vmem:[%s1632_s2 + $0x50] sm:$0xff]  ;;  %v1086_v13 = vld [vmem:[%s1632_s2 + $0x20] sm:$0xff]  ;;  %v1334_v32 = vand.u32 127, %v318_v29  ;;  %s302_s12 = scalar_lea.vmem %s1638_s8, %s1084_s7  ;;  %vm1023_vm4 = vcmp.lt.s32.totalorder %v318_v29, 256 }
  0x10   : > { %v304_v3 = vld [vmem:[%s298_s13] sm:$0x3]  ;;  %v1091_v15 = vld [vmem:[%s1632_s2 + $0x48] sm:$0xff]  ;;  %v447_v17 = vld [vmem:[%s1633_s3 + $0x18] sm:$0xff] }
  0x11   : > { %v1276_v4 = vperm.slane %v304_v3, 0  ;;  %v1285_v6 = vperm.slane %v304_v3, 1  ;;  %v305_v14 = vld [vmem:[%s1632_s2] sm:$0xff]  ;;  %v446_v18 = vld [vmem:[%s1633_s3 + $0x10] sm:$0xff]  ;;  %v445_v20 = vld [vmem:[%s1633_s3 + $0x8] sm:$0xff]  ;;  %vm320_vm0 = vcmp.lt.s32.totalorder %v1334_v32, 1 }
  0x12   : > { %v1090_v16 = vld [vmem:[%s1632_s2 + $0x40] sm:$0xff]  ;;  %vm403_vm1 = vcmp.lt.s32.totalorder %v1334_v32, 127 }
  0x13   : > { %399 = vrot.lane.b32.xlu1 %v1276_v4, %s1207_s16  ;;  %314 = vrot.lane.b32.xlu0 %v1276_v4, %s1208_s17  ;;  %v444_v19 = vld [vmem:[%s1633_s3] sm:$0xff] }
  0x14   : > { %v303_v3 = vld [vmem:[%s1631_s1] sm:$0x3] }
  0x17   : > { %375 = vperm.xlu2 %1155, %v1089_v5  }
  0x1b   : > { %401 = vrot.lane.b32.xlu1 %v1285_v6, %s1207_s16  ;;  %316 = vrot.lane.b32.xlu0 %v1285_v6, %s1208_s17 }
  0x1f   : > { %423 = vperm.xlu2 %1155, %v1093_v7  }
  0x23   : > { %370 = vperm.xlu1 %1157, %v1088_v8   ;;  %335 = vperm.xlu0 %1156, %v307_v9  }
  0x27   : > { %365 = vperm.xlu2 %1155, %v1087_v10  }
  0x2b   : > { %330 = vperm.xlu1 %1157, %v306_v11   ;;  %418 = vperm.xlu0 %1156, %v1092_v12  }
  0x2f   : > { %360 = vperm.xlu2 %1155, %v1086_v13  }
  0x33   : > { %325 = vperm.xlu1 %1157, %v305_v14   ;;  %413 = vperm.xlu0 %1156, %v1091_v15  }
  0x37   : > { %408 = vperm.xlu2 %1155, %v1090_v16  }
  0x3b   : > { %465 = vperm.xlu1 %1157, %v447_v17   ;;  %460 = vperm.xlu0 %1156, %v446_v18   ;;  %v1357_v17 = vperm.slane %v303_v3, 0 }
  0x3f   : > { %450 = vperm.xlu2 %1155, %v444_v19  }
  0x43   : > { %455 = vperm.xlu1 %1157, %v445_v20  }
  0x69   : > { %v341_v21 = vpop.permute.xlu2 %340 }
  0x71   : > { %v376_v22 = vpop.permute.xlu2 %375 }
  0x72   : > { %v384_v45 = vmul.f32 %v376_v22, %v1276_v4  ;;  %v385_v46 = vmul.f32 %v376_v22, %v1285_v6 }
  0x79   : > { %v424_v25 = vpop.permute.xlu2 %423 }
  0x81   : > { %v366_v28 = vpop.permute.xlu2 %365 }
  0x82   : > { %v380_v8 = vmul.f32 %v366_v28, %v1276_v4  ;;  %v381_v9 = vmul.f32 %v366_v28, %v1285_v6 }
  0x85   : > { %v400_v23 = vpop.permute.xlu1 %399  ;;  %v315_v24 = vpop.permute.xlu0 %314 }
  0x89   : > { %v361_v33 = vpop.permute.xlu2 %360 }
  0x8a   : > { %v378_v47 = vmul.f32 %v361_v33, %v1276_v4  ;;  %v379_v48 = vmul.f32 %v361_v33, %v1285_v6 }
  0x8d   : > { %v402_v26 = vpop.permute.xlu1 %401  ;;  %v317_v27 = vpop.permute.xlu0 %316 }
  0x8e   : > { %v321_v34 = vsel %vm320_vm0, %v315_v24, %v317_v27  ;;  %v322_v35 = vsel %vm320_vm0, %v317_v27, %v315_v24  ;;  %v404_v40 = vsel %vm403_vm1, %v400_v23, %v402_v26  ;;  %v405_v41 = vsel %vm403_vm1, %v402_v26, %v400_v23 }
  0x8f   : > { %v343_v38 = vperm.slane %v322_v35, 0  ;;  %v344_v39 = vperm.slane %v321_v34, 0  ;;  %v426_v51 = vperm.slane %v404_v40, 0  ;;  %v427_v52 = vperm.slane %v405_v41, 0 }
  0x90   : > { %v1359_v23 = vperm.slane %v303_v3, 1  ;;  %v1126_v3 = vld [vmem:[%s1636_s6 + $0x20] sm:$0xff] }
  0x91   : > { %v409_v42 = vpop.permute.xlu2 %408  ;;  %v351_v43 = vmul.f32 %v343_v38, %v341_v21  ;;  %v352_v44 = vmul.f32 %v344_v39, %v341_v21  ;;  %v434_v5 = vmul.f32 %v426_v51, %v424_v25  ;;  %v435_v7 = vmul.f32 %v427_v52, %v424_v25 }
  0x92   : > { %v428_v1 = vmul.f32 %v426_v51, %v409_v42  ;;  %v429_v2 = vmul.f32 %v427_v52, %v409_v42 }
  0x93   : > { %v392_v61 = vadd.f32 %v384_v45, %v351_v43  ;;  %v393_v62 = vadd.f32 %v385_v46, %v352_v44 }
  0x95   : > { %v371_v30 = vpop.permute.xlu1 %370  ;;  %v336_v31 = vpop.permute.xlu0 %335  ;;  %v442_v14 = vadd.f32 %v434_v5, %v392_v61  ;;  %v443_v15 = vadd.f32 %v435_v7, %v393_v62  ;;  %v779_v61 = vld [vmem:[%s1635_s5 + $0x8] sm:$0xff]  ;;  %v780_v62 = vld [vmem:[%s1635_s5 + $0x10] sm:$0xff]  ;;  %v829_v7 = vld [vmem:[%s1636_s6 + $0x18] sm:$0xff] }
  0x96   : > { %v382_v55 = vmul.f32 %v371_v30, %v1276_v4  ;;  %v383_v56 = vmul.f32 %v371_v30, %v1285_v6  ;;  %v349_v57 = vmul.f32 %v343_v38, %v336_v31  ;;  %v350_v58 = vmul.f32 %v344_v39, %v336_v31  ;;  %v1127_v5 = vld [vmem:[%s1636_s6 + $0x28] sm:$0xff] }
  0x98   : > { %v390_v10 = vadd.f32 %v382_v55, %v349_v57  ;;  %v391_v11 = vadd.f32 %v383_v56, %v350_v58 }
  0x99   : > { %v451_v25 = vpop.permute.xlu2 %450 }
  0x9d   : > { %v331_v36 = vpop.permute.xlu1 %330  ;;  %v419_v37 = vpop.permute.xlu0 %418 }
  0x9e   : > { %v432_v63 = vmul.f32 %v426_v51, %v419_v37  ;;  %v433_v0 = vmul.f32 %v427_v52, %v419_v37  ;;  %v347_v16 = vmul.f32 %v343_v38, %v331_v36  ;;  %v348_v22 = vmul.f32 %v344_v39, %v331_v36 }
  0xa0   : > { %v440_v19 = vadd.f32 %v432_v63, %v390_v10  ;;  %v441_v20 = vadd.f32 %v433_v0, %v391_v11  ;;  %v388_v35 = vadd.f32 %v380_v8, %v347_v16  ;;  %v389_v40 = vadd.f32 %v381_v9, %v348_v22  ;;  %v781_v63 = vld [vmem:[%s1635_s5 + $0x18] sm:$0xff]  ;;  %v827_v0 = vld [vmem:[%s1636_s6 + $0x8] sm:$0xff]  ;;  %v1128_v8 = vld [vmem:[%s1636_s6 + $0x30] sm:$0xff] }
  0xa1   : > { %v1130_v9 = vld [vmem:[%s1636_s6 + $0x40] sm:$0xff]  ;;  %v1131_v10 = vld [vmem:[%s1636_s6 + $0x48] sm:$0xff]  ;;  %v1132_v11 = vld [vmem:[%s1636_s6 + $0x50] sm:$0xff] }
  0xa2   : > { %v1095_v16 = vld [vmem:[%s1634_s4 + $0x28] sm:$0xff] }
  0xa5   : > { %v326_v49 = vpop.permute.xlu1 %325  ;;  %v414_v50 = vpop.permute.xlu0 %413 }
  0xa6   : > { %v345_v53 = vmul.f32 %v343_v38, %v326_v49  ;;  %v346_v54 = vmul.f32 %v344_v39, %v326_v49  ;;  %v430_v6 = vmul.f32 %v426_v51, %v414_v50  ;;  %v431_v26 = vmul.f32 %v427_v52, %v414_v50 }
  0xa8   : > { %v386_v59 = vadd.f32 %v378_v47, %v345_v53  ;;  %v387_v60 = vadd.f32 %v379_v48, %v346_v54  ;;  %v438_v43 = vadd.f32 %v430_v6, %v388_v35  ;;  %v439_v46 = vadd.f32 %v431_v26, %v389_v40 }
  0xaa   : > { %v436_v12 = vadd.f32 %v428_v1, %v386_v59  ;;  %v437_v13 = vadd.f32 %v429_v2, %v387_v60  ;;  %v778_v60 = vld [vmem:[%s1635_s5] sm:$0xff]  ;;  %v828_v1 = vld [vmem:[%s1636_s6 + $0x10] sm:$0xff] }
  0xab   : > { %v826_v2 = vld [vmem:[%s1636_s6] sm:$0xff] }
  0xac   : > { %v468_v30 = vadd.f32 %v451_v25, %v436_v12  ;;  %v469_v31 = vadd.f32 %v451_v25, %v437_v13  ;;  %v1129_v12 = vld [vmem:[%s1636_s6 + $0x38] sm:$0xff]  ;;  %v1096_v13 = vld [vmem:[%s1634_s4 + $0x30] sm:$0xff] }
  0xad   : > { %v466_v18 = vpop.permute.xlu1 %465  ;;  %v461_v21 = vpop.permute.xlu0 %460 }
  0xae   : > { %v474_v24 = vadd.f32 %v466_v18, %v442_v14  ;;  %v475_v4 = vadd.f32 %v466_v18, %v443_v15  ;;  %v472_v27 = vadd.f32 %v461_v21, %v440_v19  ;;  %v473_v28 = vadd.f32 %v461_v21, %v441_v20  ;;  %v1097_v14 = vld [vmem:[%s1634_s4 + $0x38] sm:$0xff]  ;;  %v1094_v15 = vld [vmem:[%s1634_s4 + $0x20] sm:$0xff] }
  0xaf   : > { %v476_v44 = vmax.f32 %v468_v30, 0.0  ;;  %v477_v45 = vmax.f32 %v469_v31, 0.0 }
  0xb0   : > { %v482_v33 = vmax.f32 %v474_v24, 0.0  ;;  %v483_v34 = vmax.f32 %v475_v4, 0.0  ;;  %v480_v37 = vmax.f32 %v472_v27, 0.0  ;;  %v481_v38 = vmax.f32 %v473_v28, 0.0 }
  0xb1   : > { %v489_v52 = vmul.f32 %v1357_v17, %v476_v44  ;;  %v490_v55 = vmul.f32 %v1359_v23, %v477_v45 }
  0xb2   : > { %v495_v41 = vmul.f32 %v1357_v17, %v482_v33  ;;  %v496_v36 = vmul.f32 %v1359_v23, %v483_v34  ;;  %v493_v39 = vmul.f32 %v1357_v17, %v480_v37  ;;  %v494_v42 = vmul.f32 %v1359_v23, %v481_v38 }
  0xb3   : > { %v1173_v59 = vpack.i.bf16 %v490_v55, %v489_v52 }
  0xb4   : > { %555 = vmatpush.msra.mxu0 %v495_v41  ;;  %1136 = vmatpush.msra.mxu2 %v495_v41  ;;  %v1158_v47 = vpack.i.bf16 %v496_v36, %v495_v41  ;;  %v1163_v49 = vpack.i.bf16 %v494_v42, %v493_v39 }
  0xb5   : > { %584 = vmatpush.msra.mxu1 %v496_v36  ;;  %1140 = vmatpush.msra.mxu3 %v496_v36  ;;  %v456_v48 = vpop.permute.xlu1 %455 }
  0xb6   : > { %v470_v50 = vadd.f32 %v456_v48, %v438_v43  ;;  %v471_v51 = vadd.f32 %v456_v48, %v439_v46  ;;  %1159 = vrot.lane.b32.xlu0 %v1158_v47, %s1208_s17  ;;  %556 = vmatpush.msra.mxu0 %v493_v39 }
  0xb7   : > { %585 = vmatpush.msra.mxu1 %v494_v42  ;;  %1141 = vmatpush.msra.mxu3 %v494_v42 }
  0xb8   : > { %v478_v53 = vmax.f32 %v470_v50, 0.0  ;;  %v479_v54 = vmax.f32 %v471_v51, 0.0  ;;  %1164 = vrot.lane.b32.xlu1 %v1163_v49, %s1208_s17  ;;  %1137 = vmatpush.msra.mxu2 %v493_v39  ;;  %v497_v39 = vld [vmem:[%s1634_s4] sm:$0xff] }
  0xba   : > { %v491_v56 = vmul.f32 %v1357_v17, %v478_v53  ;;  %v492_v57 = vmul.f32 %v1359_v23, %v479_v54  ;;  %v498_v54 = vld [vmem:[%s1634_s4 + $0x8] sm:$0xff] }
  0xbc   : > { %557 = vmatpush.msra.mxu0 %v491_v56  ;;  %1138 = vmatpush.msra.mxu2 %v491_v56  ;;  %v1168_v58 = vpack.i.bf16 %v492_v57, %v491_v56 }
  0xbd   : > { %586 = vmatpush.msra.mxu1 %v492_v57  ;;  %1142 = vmatpush.msra.mxu3 %v492_v57 }
  0xbe   : > { %1169 = vrot.lane.b32.xlu2 %v1168_v58, %s1208_s17  ;;  %1174 = vrot.lane.b32.xlu0 %v1173_v59, %s1208_s17 }
  0xbf   : > { %587 = vmatpush.msra.mxu1 %v490_v55  ;;  %1143 = vmatpush.msra.mxu3 %v490_v55 }
  0xc0   : > { %1179 = vrot.lane.b32.xlu1 %v1158_v47, %s1207_s16  ;;  %558 = vmatpush.msra.mxu0 %v489_v52 }
  0xc1   : > { %1139 = vmatpush.msra.mxu2 %v489_v52  ;;  %1104 = vmatmul.msk.f32.vlgmr.msra.gmra.mxu3 %vm530_vm2, %v1096_v13 }
  0xc2   : > { %1100 = vmatmul.msk.f32.vlgmr.msra.gmra.mxu2 %vm530_vm2, %v1096_v13  ;;  %1098 = vmatmul.msk.f32.vlgmr.msra.gmra.mxu0 %vm530_vm2, %v1094_v15 }
  0xc3   : > { %1102 = vmatmul.msk.f32.vlgmr.msra.gmra.mxu1 %vm530_vm2, %v1094_v15 }
  0xc6   : > { %1184 = vrot.lane.b32.xlu2 %v1163_v49, %s1207_s16  ;;  %1189 = vrot.lane.b32.xlu0 %v1168_v58, %s1207_s16 }
  0xc8   : > { %1194 = vrot.lane.b32.xlu1 %v1173_v59, %s1207_s16  ;;  %v1114_v59 = vld [vmem:[%s1634_s4 + $0x40] sm:$0xff] }
  0xc9   : > { %1105 = vmatmul.msk.f32.gmra.mxu3 %vm530_vm2, %v1097_v14 }
  0xca   : > { %1101 = vmatmul.msk.f32.gmra.mxu2 %vm530_vm2, %v1097_v14  ;;  %1099 = vmatmul.msk.f32.gmra.mxu0 %vm530_vm2, %v1095_v16 }
  0xcb   : > { %1103 = vmatmul.msk.f32.gmra.mxu1 %vm530_vm2, %v1095_v16 }
  0xce   : > { %784 = vperm.xlu2 %1155, %v778_v60   ;;  %789 = vperm.xlu0 %1156, %v779_v61  }
  0xd0   : > { %794 = vperm.xlu1 %1157, %v780_v62   ;;  %v499_v62 = vld [vmem:[%s1634_s4 + $0x10] sm:$0xff] }
  0xd6   : > { %799 = vperm.xlu2 %1155, %v781_v63   ;;  %861 = vperm.xlu0 %1156, %v827_v0   ;;  %v1115_v63 = vld [vmem:[%s1634_s4 + $0x48] sm:$0xff]  ;;  %v500_v0 = vld [vmem:[%s1634_s4 + $0x18] sm:$0xff] }
  0xd8   : > { %866 = vperm.xlu1 %1157, %v828_v1   ;;  %v1116_v1 = vld [vmem:[%s1634_s4 + $0x50] sm:$0xff] }
  0xde   : > { %856 = vperm.xlu2 %1155, %v826_v2   ;;  %889 = vperm.xlu0 %1156, %v1126_v3   ;;  %v1117_v2 = vld [vmem:[%s1634_s4 + $0x58] sm:$0xff] }
  0xe0   : > { %894 = vperm.xlu1 %1157, %v1127_v5  }
  0xe6   : > { %871 = vperm.xlu2 %1155, %v829_v7   ;;  %899 = vperm.xlu0 %1156, %v1128_v8  }
  0xe8   : > { %954 = vperm.xlu1 %1157, %v1130_v9  }
  0xee   : > { %959 = vperm.xlu2 %1155, %v1131_v10   ;;  %964 = vperm.xlu0 %1156, %v1132_v11  }
  0xf6   : > { %904 = vperm.xlu2 %1155, %v1129_v12  }
 0x118   : > { %v1170_v18 = vpop.permute.xlu2 %1169 }
 0x119   : > { %v1172_v22 = vunpack.i.h.bf16 %v1170_v18  ;;  %v1171_v24 = vunpack.i.l.bf16 %v1170_v18 }
 0x11b   : > { %v518_v33 = vsel %vm320_vm0, %v1171_v24, %v1172_v22  ;;  %v522_v34 = vsel %vm320_vm0, %v1172_v22, %v1171_v24 }
 0x120   : > { %v1185_v31 = vpop.permute.xlu2 %1184 }
 0x121   : > { %v1187_v40 = vunpack.i.h.bf16 %v1185_v31  ;;  %v1186_v41 = vunpack.i.l.bf16 %v1185_v31 }
 0x123   : > { %v694_v48 = vsel %vm403_vm1, %v1186_v41, %v1187_v40  ;;  %v698_v49 = vsel %vm403_vm1, %v1187_v40, %v1186_v41 }
 0x128   : > { %v1160_v19 = vpop.permute.xlu0 %1159  ;;  %v785_v22 = vpop.permute.xlu2 %784 }
 0x129   : > { %v1162_v20 = vunpack.i.h.bf16 %v1160_v19  ;;  %v1161_v21 = vunpack.i.l.bf16 %v1160_v19 }
 0x12a   : > { %v1165_v4 = vpop.permute.xlu1 %1164 }
 0x12b   : > { %v1167_v25 = vunpack.i.h.bf16 %v1165_v4  ;;  %v1166_v6 = vunpack.i.l.bf16 %v1165_v4  ;;  %v524_v26 = vsel %vm320_vm0, %v1162_v20, %v1161_v21  ;;  %v520_v27 = vsel %vm320_vm0, %v1161_v21, %v1162_v20 }
 0x12c   : > { %625 = vmatpush.msrb.mxu2 %v524_v26  ;;  %654 = vmatpush.msrb.mxu3 %v520_v27 }
 0x12d   : > { %v523_v28 = vsel %vm320_vm0, %v1167_v25, %v1166_v6  ;;  %v519_v30 = vsel %vm320_vm0, %v1166_v6, %v1167_v25 }
 0x12e   : > { %626 = vmatpush.msrb.mxu2 %v523_v28  ;;  %655 = vmatpush.msrb.mxu3 %v519_v30 }
 0x130   : > { %656 = vmatpush.msrb.mxu3 %v518_v33  ;;  %v1175_v35 = vpop.permute.xlu0 %1174  ;;  %627 = vmatpush.msrb.mxu2 %v522_v34 }
 0x131   : > { %v1177_v37 = vunpack.i.h.bf16 %v1175_v35  ;;  %v1176_v38 = vunpack.i.l.bf16 %v1175_v35 }
 0x132   : > { %v1180_v36 = vpop.permute.xlu1 %1179 }
 0x133   : > { %v1182_v42 = vunpack.i.h.bf16 %v1180_v36  ;;  %v1181_v43 = vunpack.i.l.bf16 %v1180_v36  ;;  %v521_v44 = vsel %vm320_vm0, %v1177_v37, %v1176_v38  ;;  %v517_v45 = vsel %vm320_vm0, %v1176_v38, %v1177_v37 }
 0x134   : > { %628 = vmatpush.msrb.mxu2 %v521_v44  ;;  %657 = vmatpush.msrb.mxu3 %v517_v45 }
 0x135   : > { %v695_v46 = vsel %vm403_vm1, %v1181_v43, %v1182_v42  ;;  %v699_v47 = vsel %vm403_vm1, %v1182_v42, %v1181_v43  ;;  %1106 = vmatmul.msk.f32.vlgmr.msrb.gmra.mxu2 %vm530_vm2, %v497_v39  ;;  %1110 = vmatmul.msk.f32.vlgmr.msrb.gmra.mxu3 %vm530_vm2, %v497_v39 }
 0x136   : > { %724 = vmatpush.msrb.mxu0 %v695_v46  ;;  %753 = vmatpush.msrb.mxu1 %v699_v47 }
 0x138   : > { %725 = vmatpush.msrb.mxu0 %v694_v48  ;;  %754 = vmatpush.msrb.mxu1 %v698_v49  ;;  %v1190_v50 = vpop.permute.xlu0 %1189 }
 0x139   : > { %v1192_v51 = vunpack.i.h.bf16 %v1190_v50  ;;  %v1191_v52 = vunpack.i.l.bf16 %v1190_v50 }
 0x13a   : > { %v1195_v53 = vpop.permute.xlu1 %1194 }
 0x13b   : > { %v1197_v55 = vunpack.i.h.bf16 %v1195_v53  ;;  %v1196_v56 = vunpack.i.l.bf16 %v1195_v53  ;;  %v693_v57 = vsel %vm403_vm1, %v1191_v52, %v1192_v51  ;;  %v697_v58 = vsel %vm403_vm1, %v1192_v51, %v1191_v52 }
 0x13c   : > { %726 = vmatpush.msrb.mxu0 %v693_v57  ;;  %755 = vmatpush.msrb.mxu1 %v697_v58 }
 0x13d   : > { %1107 = vmatmul.msk.f32.gmra.mxu2 %vm530_vm2, %v498_v54  ;;  %1111 = vmatmul.msk.f32.gmra.mxu3 %vm530_vm2, %v498_v54  ;;  %v692_v60 = vsel %vm403_vm1, %v1196_v56, %v1197_v55  ;;  %v696_v61 = vsel %vm403_vm1, %v1197_v55, %v1196_v56 }
 0x13e   : > { %727 = vmatpush.msrb.mxu0 %v692_v60  ;;  %756 = vmatpush.msrb.mxu1 %v696_v61 }
 0x13f   : > { %1118 = vmatmul.msk.f32.vlgmr.msrb.gmra.mxu0 %vm530_vm2, %v1114_v59  ;;  %1122 = vmatmul.msk.f32.vlgmr.msrb.gmra.mxu1 %vm530_vm2, %v1114_v59  ;;  %v560_v7 = vpop.f32.mrf.mxu0 }
 0x140   : > { %v589_v8 = vpop.f32.mrf.mxu1  ;;  %v790_v40 = vpop.permute.xlu0 %789 }
 0x142   : > { %v795_v52 = vpop.permute.xlu1 %794 }
 0x144   : > { %v595_v5 = vpop.f32.mrf.mxu3 }
 0x145   : > { %1108 = vmatmul.msk.f32.gmra.mxu2 %vm530_vm2, %v499_v62  ;;  %1112 = vmatmul.msk.f32.gmra.mxu3 %vm530_vm2, %v499_v62  ;;  %v566_v3 = vpop.f32.mrf.mxu2 }
 0x147   : > { %1119 = vmatmul.msk.f32.gmra.mxu0 %vm530_vm2, %v1115_v63  ;;  %1123 = vmatmul.msk.f32.gmra.mxu1 %vm530_vm2, %v1115_v63  ;;  %v563_v11 = vpop.f32.mrf.mxu0 }
 0x148   : > { %v592_v12 = vpop.f32.mrf.mxu1 }
 0x14c   : > { %v598_v10 = vpop.f32.mrf.mxu3 }
 0x14d   : > { %1109 = vmatmul.msk.f32.gmra.mxu2 %vm530_vm2, %v500_v0  ;;  %1113 = vmatmul.msk.f32.gmra.mxu3 %vm530_vm2, %v500_v0  ;;  %v569_v9 = vpop.f32.mrf.mxu2 }
 0x14f   : > { %1120 = vmatmul.msk.f32.gmra.mxu0 %vm530_vm2, %v1116_v1  ;;  %1124 = vmatmul.msk.f32.gmra.mxu1 %vm530_vm2, %v1116_v1 }
 0x157   : > { %1121 = vmatmul.msk.f32.gmra.mxu0 %vm530_vm2, %v1117_v2  ;;  %1125 = vmatmul.msk.f32.gmra.mxu1 %vm530_vm2, %v1117_v2 }
 0x1b8   : > { %v630_v13 = vpop.f32.mrf.mxu2  ;;  %v659_v14 = vpop.f32.mrf.mxu3 }
 0x1b9   : > { %v631_v15 = vadd.f32 %v630_v13, %v560_v7  ;;  %v660_v16 = vadd.f32 %v659_v14, %v589_v8  ;;  %v1133_v13 = vld [vmem:[%s1636_s6 + $0x58] sm:$0xff] }
 0x1bc   : > { %v729_v18 = vpop.f32.mrf.mxu0  ;;  %v758_v19 = vpop.f32.mrf.mxu1 }
 0x1bd   : > { %v770_v20 = vadd.f32 %v729_v18, %v631_v15  ;;  %v771_v21 = vadd.f32 %v758_v19, %v660_v16  ;;  %v862_v15 = vpop.permute.xlu0 %861  ;;  %v867_v18 = vpop.permute.xlu1 %866 }
 0x1bf   : > { %v802_v24 = vadd.f32 %v785_v22, %v770_v20  ;;  %v803_v4 = vadd.f32 %v785_v22, %v771_v21 }
 0x1c0   : > { %v633_v25 = vpop.f32.mrf.mxu2  ;;  %v662_v6 = vpop.f32.mrf.mxu3 }
 0x1c1   : > { %v810_v26 = vmax.f32 %v802_v24, 0.0  ;;  %v811_v27 = vmax.f32 %v803_v4, 0.0  ;;  %v634_v28 = vadd.f32 %v633_v25, %v563_v11  ;;  %v663_v30 = vadd.f32 %v662_v6, %v592_v12 }
 0x1c3   : > { %v1515_v31 = vmul.f32 %v811_v27, %v1359_v23  ;;  %v1518_v33 = vmul.f32 %v810_v26, %v1357_v17 }
 0x1c4   : > { %v732_v34 = vpop.f32.mrf.mxu0  ;;  %v761_v35 = vpop.f32.mrf.mxu1 }
 0x1c5   : > { %v772_v37 = vadd.f32 %v732_v34, %v634_v28  ;;  %v773_v38 = vadd.f32 %v761_v35, %v663_v30  ;;  %838 = vrot.lane.b32.xlu1 %v1515_v31, %s1208_s17  ;;  %928 = vrot.lane.b32.xlu2 %v1518_v33, %s1207_s16  ;;  %v890_v19 = vpop.permute.xlu0 %889  ;;  %v895_v21 = vpop.permute.xlu1 %894 }
 0x1c6   : > { %830 = vrot.lane.b32.xlu0 %v1518_v33, %s1208_s17 }
 0x1c7   : > { %v804_v41 = vadd.f32 %v790_v40, %v772_v37  ;;  %v805_v36 = vadd.f32 %v790_v40, %v773_v38 }
 0x1c8   : > { %v665_v39 = vpop.f32.mrf.mxu3  ;;  %v636_v44 = vpop.f32.mrf.mxu2 }
 0x1c9   : > { %v812_v42 = vmax.f32 %v804_v41, 0.0  ;;  %v813_v43 = vmax.f32 %v805_v36, 0.0  ;;  %v666_v45 = vadd.f32 %v665_v39, %v595_v5  ;;  %v637_v50 = vadd.f32 %v636_v44, %v566_v3  ;;  %v800_v3 = vpop.permute.xlu2 %799 }
 0x1ca   : > { %v908_v39 = vmul.f32 %v890_v19, %v1515_v31 }
 0x1cb   : > { %v1527_v46 = vmul.f32 %v813_v43, %v1359_v23  ;;  %v1530_v47 = vmul.f32 %v812_v42, %v1357_v17  ;;  %v907_v42 = vmul.f32 %v890_v19, %v1518_v33 }
 0x1cc   : > { %v735_v48 = vpop.f32.mrf.mxu0  ;;  %v764_v49 = vpop.f32.mrf.mxu1 }
 0x1cd   : > { %v775_v51 = vadd.f32 %v764_v49, %v666_v45  ;;  %936 = vrot.lane.b32.xlu1 %v1515_v31, %s1207_s16  ;;  %840 = vrot.lane.b32.xlu2 %v1527_v46, %s1208_s17  ;;  %v774_v53 = vadd.f32 %v735_v48, %v637_v50  ;;  %v900_v22 = vpop.permute.xlu0 %899  ;;  %v955_v4 = vpop.permute.xlu1 %954  ;;  %v910_v49 = vmul.f32 %v895_v21, %v1527_v46 }
 0x1ce   : > { %930 = vrot.lane.b32.xlu0 %v1530_v47, %s1207_s16  ;;  %v909_v31 = vmul.f32 %v895_v21, %v1530_v47 }
 0x1cf   : > { %v807_v54 = vadd.f32 %v795_v52, %v775_v51  ;;  %v806_v57 = vadd.f32 %v795_v52, %v774_v53 }
 0x1d0   : > { %v668_v56 = vpop.f32.mrf.mxu3  ;;  %v639_v58 = vpop.f32.mrf.mxu2 }
 0x1d1   : > { %v815_v55 = vmax.f32 %v807_v54, 0.0  ;;  %v669_v61 = vadd.f32 %v668_v56, %v598_v10  ;;  %v640_v63 = vadd.f32 %v639_v58, %v569_v9  ;;  %v814_v0 = vmax.f32 %v806_v57, 0.0 }
 0x1d3   : > { %v1539_v59 = vmul.f32 %v815_v55, %v1359_v23  ;;  %v1548_v7 = vmul.f32 %v814_v0, %v1357_v17 }
 0x1d4   : > { %v767_v60 = vpop.f32.mrf.mxu1  ;;  %v738_v62 = vpop.f32.mrf.mxu0 }
 0x1d5   : > { %938 = vrot.lane.b32.xlu2 %v1527_v46, %s1207_s16  ;;  %832 = vrot.lane.b32.xlu1 %v1530_v47, %s1208_s17  ;;  %v777_v1 = vadd.f32 %v767_v60, %v669_v61  ;;  %v776_v2 = vadd.f32 %v738_v62, %v640_v63  ;;  %v965_v25 = vpop.permute.xlu0 %964 }
 0x1d6   : > { %842 = vrot.lane.b32.xlu0 %v1539_v59, %s1208_s17 }
 0x1d7   : > { %v809_v5 = vadd.f32 %v800_v3, %v777_v1  ;;  %v808_v8 = vadd.f32 %v800_v3, %v776_v2 }
 0x1d9   : > { %v817_v9 = vmax.f32 %v809_v5, 0.0  ;;  %v816_v10 = vmax.f32 %v808_v8, 0.0 }
 0x1db   : > { %v1557_v11 = vmul.f32 %v817_v9, %v1359_v23  ;;  %v1560_v12 = vmul.f32 %v816_v10, %v1357_v17  ;;  %v1006_v23 = vld [vmem:[#allocation2] sm:$0x1]  ;;  %v857_v17 = vpop.permute.xlu2 %856 }
 0x1dd   : > { %834 = vrot.lane.b32.xlu2 %v1548_v7, %s1208_s17  ;;  %940 = vrot.lane.b32.xlu1 %v1539_v59, %s1207_s16 }
 0x1de   : > { %932 = vrot.lane.b32.xlu0 %v1548_v7, %s1207_s16 }
 0x1e3   : > { %v1573_v14 = vpop.permute.xlu2 %871 }
 0x1e5   : > { %942 = vrot.lane.b32.xlu2 %v1557_v11, %s1207_s16  ;;  %844 = vrot.lane.b32.xlu1 %v1557_v11, %s1208_s17 }
 0x1e6   : > { %836 = vrot.lane.b32.xlu0 %v1560_v12, %s1208_s17 }
 0x1eb   : > { %v960_v16 = vpop.permute.xlu2 %959 }
 0x1ed   : > { %934 = vrot.lane.b32.xlu1 %v1560_v12, %s1207_s16 }
 0x1ee   : > { %969 = vperm.xlu0 %1156, %v1133_v13   ;;  %v911_v13 = vmul.f32 %v900_v22, %v1548_v7 }
 0x1f3   : > { %v1575_v20 = vpop.permute.xlu2 %904 }
 0x1f5   : > { %1009 = vperm.xlu1 %1157, %v1006_v23   ;;  %v912_v23 = vmul.f32 %v900_v22, %v1539_v59 }
 0x21f   : > { %v929_v24 = vpop.permute.xlu2 %928 }
 0x227   : > { %v841_v6 = vpop.permute.xlu2 %840 }
 0x22f   : > { %v939_v30 = vpop.permute.xlu2 %938 }
 0x237   : > { %v839_v26 = vpop.permute.xlu1 %838  ;;  %v835_v57 = vpop.permute.xlu2 %834 }
 0x238   : > { %v831_v27 = vpop.permute.xlu0 %830 }
 0x239   : > { %v846_v35 = vsel %vm320_vm0, %v831_v27, %v839_v26  ;;  %v850_v37 = vsel %vm320_vm0, %v839_v26, %v831_v27 }
 0x23a   : > { %v874_v38 = vmul.f32 %v857_v17, %v850_v37  ;;  %v875_v40 = vmul.f32 %v857_v17, %v846_v35  ;;  %v914_v37 = vmul.f32 %v1575_v20, %v1557_v11 }
 0x23c   : > { %v915_v55 = vadd.f32 %v907_v42, %v874_v38  ;;  %v916_v56 = vadd.f32 %v908_v39, %v875_v40 }
 0x23f   : > { %v937_v28 = vpop.permute.xlu1 %936  ;;  %v943_v35 = vpop.permute.xlu2 %942 }
 0x240   : > { %v931_v34 = vpop.permute.xlu0 %930  ;;  %v944_v41 = vsel %vm403_vm1, %v929_v24, %v937_v28  ;;  %v948_v36 = vsel %vm403_vm1, %v937_v28, %v929_v24 }
 0x241   : > { %v945_v43 = vsel %vm403_vm1, %v931_v34, %v939_v30  ;;  %v949_v44 = vsel %vm403_vm1, %v939_v30, %v931_v34  ;;  %v972_v52 = vmul.f32 %v955_v4, %v944_v41  ;;  %v973_v33 = vmul.f32 %v955_v4, %v948_v36 }
 0x242   : > { %v974_v58 = vmul.f32 %v960_v16, %v945_v43  ;;  %v975_v60 = vmul.f32 %v960_v16, %v949_v44 }
 0x243   : > { %v980_v0 = vadd.f32 %v972_v52, %v915_v55  ;;  %v981_v1 = vadd.f32 %v973_v33, %v916_v56 }
 0x247   : > { %v833_v45 = vpop.permute.xlu1 %832 }
 0x248   : > { %v843_v48 = vpop.permute.xlu0 %842  ;;  %v847_v50 = vsel %vm320_vm0, %v833_v45, %v841_v6  ;;  %v851_v51 = vsel %vm320_vm0, %v841_v6, %v833_v45 }
 0x249   : > { %v876_v53 = vmul.f32 %v862_v15, %v851_v51  ;;  %v877_v54 = vmul.f32 %v862_v15, %v847_v50  ;;  %v848_v46 = vsel %vm320_vm0, %v835_v57, %v843_v48  ;;  %v852_v61 = vsel %vm320_vm0, %v843_v48, %v835_v57 }
 0x24a   : > { %v878_v3 = vmul.f32 %v867_v18, %v852_v61  ;;  %v879_v5 = vmul.f32 %v867_v18, %v848_v46 }
 0x24b   : > { %v917_v62 = vadd.f32 %v909_v31, %v876_v53  ;;  %v918_v63 = vadd.f32 %v910_v49, %v877_v54 }
 0x24c   : > { %v919_v19 = vadd.f32 %v911_v13, %v878_v3  ;;  %v920_v21 = vadd.f32 %v912_v23, %v879_v5 }
 0x24d   : > { %v982_v47 = vadd.f32 %v974_v58, %v917_v62  ;;  %v983_v2 = vadd.f32 %v975_v60, %v918_v63 }
 0x24f   : > { %v997_v8 = vadd.f32 %v983_v2, %v981_v1  ;;  %v941_v9 = vpop.permute.xlu1 %940  ;;  %v988_v10 = vadd.f32 %v982_v47, %v980_v0 }
 0x250   : > { %v933_v17 = vpop.permute.xlu0 %932 }
 0x251   : > { %v946_v15 = vsel %vm403_vm1, %v933_v17, %v941_v9  ;;  %v950_v16 = vsel %vm403_vm1, %v941_v9, %v933_v17 }
 0x252   : > { %v976_v24 = vmul.f32 %v965_v25, %v946_v15  ;;  %v977_v4 = vmul.f32 %v965_v25, %v950_v16  ;;  %v913_v25 = vmul.f32 %v1575_v20, %v1560_v12 }
 0x254   : > { %v984_v6 = vadd.f32 %v976_v24, %v919_v19  ;;  %v985_v18 = vadd.f32 %v977_v4, %v920_v21 }
 0x256   : > { %v989_v26 = vadd.f32 %v988_v10, %v984_v6  ;;  %v998_v27 = vadd.f32 %v997_v8, %v985_v18 }
 0x257   : > { %v845_v28 = vpop.permute.xlu1 %844 }
 0x258   : > { %v837_v30 = vpop.permute.xlu0 %836 }
 0x259   : > { %v849_v59 = vsel %vm320_vm0, %v837_v30, %v845_v28  ;;  %v853_v7 = vsel %vm320_vm0, %v845_v28, %v837_v30 }
 0x25a   : > { %v880_v22 = vmul.f32 %v1573_v14, %v853_v7  ;;  %v881_v34 = vmul.f32 %v1573_v14, %v849_v59 }
 0x25c   : > { %v921_v39 = vadd.f32 %v913_v25, %v880_v22  ;;  %v922_v42 = vadd.f32 %v914_v37, %v881_v34 }
 0x25f   : > { %v935_v38 = vpop.permute.xlu1 %934 }
 0x260   : > { %v970_v40 = vpop.permute.xlu0 %969  ;;  %v947_v41 = vsel %vm403_vm1, %v935_v38, %v943_v35  ;;  %v951_v36 = vsel %vm403_vm1, %v943_v35, %v935_v38 }
 0x261   : > { %v978_v43 = vmul.f32 %v970_v40, %v947_v41  ;;  %v979_v44 = vmul.f32 %v970_v40, %v951_v36 }
 0x263   : > { %v986_v14 = vadd.f32 %v978_v43, %v921_v39  ;;  %v987_v45 = vadd.f32 %v979_v44, %v922_v42 }
 0x265   : > { %v990_v48 = vadd.f32 %v989_v26, %v986_v14  ;;  %v999_v49 = vadd.f32 %v998_v27, %v987_v45 }
 0x267   : > { %v991_v12 = vrot.slane %v990_v48, 4  ;;  %v1000_v50 = vrot.slane %v999_v49, 4  ;;  %v1010_v53 = vpop.permute.xlu1 %1009 }
 0x268   : > { %v1012_v57 = vperm.slane %v1010_v53, 0 }
 0x269   : > { %v1001_v11 = vadd.f32 %v1000_v50, %v999_v49  ;;  %v992_v20 = vadd.f32 %v991_v12, %v990_v48 }
 0x26b   : > { %v1002_v51 = vrot.slane %v1001_v11, 2  ;;  %v993_v31 = vrot.slane %v992_v20, 2 }
 0x26d   : > { %v1003_v52 = vadd.f32 %v1002_v51, %v1001_v11  ;;  %v994_v33 = vadd.f32 %v993_v31, %v992_v20 }
 0x26f   : > { %v1004_v32 = vrot.slane %v1003_v52, 1  ;;  %v995_v54 = vrot.slane %v994_v33, 1 }
 0x271   : > { %v1005_v55 = vadd.f32 %v1004_v32, %v1003_v52  ;;  %v996_v56 = vadd.f32 %v995_v54, %v994_v33 }
 0x273   : > { %v1014_v58 = vadd.f32 %v1012_v57, %v1005_v55  ;;  %v1013_v60 = vadd.f32 %v1012_v57, %v996_v56 }
 0x275   : > { %v1017_v46 = vrot.slane %v1014_v58, 7 }
 0x277   : > { %v1019_v61 = vsel %vm1018_vm3, %v1013_v60, %v1017_v46 }
 0x278   : > { %1025 = vst.msk [vmem:[%s302_s12] sm:$0x3] %vm1023_vm4, %v1019_v61 }
 0x279 PF: > { %s20_s29 = sadd.s32 1, %s1204_s29  }
 0x27a   : > { %p17_p4 = scmp.ge.s32.totalorder %s20_s29, 4  }
 0x27c   :  { %19 = sbr.rel (!%p17_p4) target bundleno = 3 (0x3), region = 88 }

</bundles_post_ra>
